<compile_context>
chip_gen: v6e
topology: v6e:2x2x1
jax: 0.10.0
libtpu: 0.0.40
codegen_flags: <defaults>
</compile_context>

<pallas_src>
import jax
import jax.numpy as jnp
import numpy as np
from jax.experimental import pallas as pl
from jax.experimental.pallas import tpu as pltpu


def _nce_dsl_loss_kernel(temp_ref, vis_ref, text_ref, loss_ref):
    vis = vis_ref[...]          # [N, D] (fed to the MXU as-is)
    text = text_ref[...]        # [N, D]

    # logit_scale = exp(temp): (1,1) vector exp (EUP), broadcast-multiplied below.
    logit_scale = jnp.exp(temp_ref[...])                       # (1, 1)

    # S[i, j] = <vis_i, text_j> * logit_scale ; contraction over the shared last
    # dim so the MXU consumes the 'nt' form directly (no XLU transpose).
    s = jax.lax.dot_general(
        vis, text,
        dimension_numbers=(((1,), (1,)), ((), ())),
        preferred_element_type=jnp.float32,
    ) * logit_scale                                            # (N, N)

    n = s.shape[0]

    # --- t2v branch: A = S * softmax(S, axis=0)  (column softmax) ---
    cmax = jnp.max(s, axis=0, keepdims=True)                   # (1, N)
    cexp = jnp.exp(s - cmax)
    csum = jnp.sum(cexp, axis=0, keepdims=True)                # (1, N)
    a = s * (cexp / csum)                                      # (N, N)

    # --- v2t branch: B = (S * softmax(S, axis=1)).T ; keep it untransposed as C.
    rmax = jnp.max(s, axis=1, keepdims=True)                   # (N, 1)
    rexp = jnp.exp(s - rmax)
    rsum = jnp.sum(rexp, axis=1, keepdims=True)                # (N, 1)
    c = s * (rexp / rsum)                                      # (N, N)

    # CE(A, arange): row-wise logsumexp of A.
    amax = jnp.max(a, axis=1, keepdims=True)                   # (N, 1)
    a_lse = jnp.log(jnp.sum(jnp.exp(a - amax), axis=1, keepdims=True)) + amax

    # CE(B, arange): B = C.T, so its row-LSE == column-LSE of C (no transpose).
    bmax = jnp.max(c, axis=0, keepdims=True)                   # (1, N)
    b_lse = jnp.log(jnp.sum(jnp.exp(c - bmax), axis=0, keepdims=True)) + bmax

    # diag(A) + diag(C) in a single masked reduce (one iota mask, no gather).
    rows = jax.lax.broadcasted_iota(jnp.int32, (n, n), 0)
    cols = jax.lax.broadcasted_iota(jnp.int32, (n, n), 1)
    diag_sum = jnp.sum(jnp.where(rows == cols, a + c, 0.0))

    loss = (jnp.sum(a_lse) + jnp.sum(b_lse) - diag_sum) / jnp.float32(n)
    loss_ref[0, 0] = loss


def nce_learnable_temp_dsl_loss(vis_feat, text_feat, temp):
    """vis_feat: [N, D], text_feat: [N, D], temp: scalar -> scalar f32 loss."""
    temp_arr = jnp.asarray(temp, dtype=jnp.float32).reshape(1, 1)
    out = pl.pallas_call(
        _nce_dsl_loss_kernel,
        out_shape=jax.ShapeDtypeStruct((1, 1), jnp.float32),
        # Whole-array resident blocks, no grid: avoids pipeline prologue/epilogue
        # and input double-buffering for data that is fetched exactly once.
        in_specs=[
            pl.BlockSpec(memory_space=pltpu.VMEM),   # temp (1,1)
            pl.BlockSpec(memory_space=pltpu.VMEM),   # vis_feat
            pl.BlockSpec(memory_space=pltpu.VMEM),   # text_feat
        ],
        out_specs=pl.BlockSpec(memory_space=pltpu.SMEM),
    )(temp_arr, vis_feat, text_feat)
    return out[0, 0]


def _reference_loss(vis, text, temp):
    """NumPy mirror of the PyTorch forward."""
    vis = vis.astype(np.float32)
    text = text.astype(np.float32)
    scale = np.exp(np.float32(temp))
    s = (vis @ text.T) * scale

    def softmax0(x):
        m = x.max(axis=0, keepdims=True)
        e = np.exp(x - m)
        return e / e.sum(axis=0, keepdims=True)

    t2v = s * softmax0(s)
    st = s.T
    v2t = st * softmax0(st)

    def ce(lg):
        m = lg.max(axis=1, keepdims=True)
        lse = np.log(np.exp(lg - m).sum(axis=1, keepdims=True)) + m
        return float(np.mean(lse[:, 0] - np.diag(lg)))

    return ce(t2v) + ce(v2t)


if __name__ == "__main__":
    key = jax.random.PRNGKey(0)
    k1, k2 = jax.random.split(key)
    N, D = 8, 32  # small batch of paired (vis, text) embeddings
    vis_feat = jax.random.normal(k1, (N, D), dtype=jnp.float32)
    text_feat = jax.random.normal(k2, (N, D), dtype=jnp.float32)
    temp = jnp.float32(np.log(1.0 / 0.07))  # learnable temperature (CLIP-style init)

    loss = nce_learnable_temp_dsl_loss(vis_feat, text_feat, temp)
    jax.block_until_ready(loss)

    ref = _reference_loss(np.asarray(vis_feat), np.asarray(text_feat), float(temp))
    np.testing.assert_allclose(np.asarray(loss), ref, rtol=1e-4, atol=1e-4)

    print("KERNEL_OK")
</pallas_src>

<mosaic_0001>
module attributes {stable_mosaic.version = 11 : i64} {
  func.func @_nce_dsl_loss_kernel(%arg0: memref<1x1xf32, #tpu.memory_space<vmem>>, %arg1: memref<8x32xf32, #tpu.memory_space<vmem>>, %arg2: memref<8x32xf32, #tpu.memory_space<vmem>>, %arg3: memref<1x1xf32, #tpu.memory_space<smem>>) attributes {dimension_semantics = [], scalar_prefetch = 0 : i64, scratch_operands = 0 : i64, tpu.core_type = #tpu.core_type<tc>} {
    %c0 = arith.constant 0 : index
    %c0_0 = arith.constant 0 : index
    %0 = vector.load %arg1[%c0, %c0_0] : memref<8x32xf32, #tpu.memory_space<vmem>>, vector<8x32xf32>
    %c0_1 = arith.constant 0 : index
    %c0_2 = arith.constant 0 : index
    %1 = vector.load %arg2[%c0_1, %c0_2] : memref<8x32xf32, #tpu.memory_space<vmem>>, vector<8x32xf32>
    %c0_3 = arith.constant 0 : index
    %c0_4 = arith.constant 0 : index
    %2 = vector.load %arg0[%c0_3, %c0_4] : memref<1x1xf32, #tpu.memory_space<vmem>>, vector<1x1xf32>
    %3 = math.exp %2 : vector<1x1xf32>
    %cst = arith.constant dense<0.000000e+00> : vector<8x8xf32>
    %4 = tpu.matmul %0, %1, %cst {dimension_numbers = #tpu.dot_dimension_numbers<[1], [1], [0], [0], [0, 0, 1, 0], [], []>} : vector<8x32xf32>, vector<8x32xf32>, vector<8x8xf32> -> vector<8x8xf32>
    %5 = vector.broadcast %3 : vector<1x1xf32> to vector<8x8xf32>
    %6 = arith.mulf %4, %5 : vector<8x8xf32>
    %cst_5 = arith.constant dense<0xFF800000> : vector<8xf32>
    %7 = vector.multi_reduction <maximumf>, %6, %cst_5 [0] : vector<8x8xf32> to vector<8xf32>
    %8 = vector.shape_cast %7 : vector<8xf32> to vector<1x8xf32>
    %9 = vector.broadcast %8 : vector<1x8xf32> to vector<8x8xf32>
    %10 = arith.subf %6, %9 : vector<8x8xf32>
    %11 = math.exp %10 : vector<8x8xf32>
    %cst_6 = arith.constant dense<0.000000e+00> : vector<8xf32>
    %12 = vector.multi_reduction <add>, %11, %cst_6 [0] : vector<8x8xf32> to vector<8xf32>
    %13 = vector.shape_cast %12 : vector<8xf32> to vector<1x8xf32>
    %14 = vector.broadcast %13 : vector<1x8xf32> to vector<8x8xf32>
    %15 = arith.divf %11, %14 : vector<8x8xf32>
    %16 = arith.mulf %6, %15 : vector<8x8xf32>
    %cst_7 = arith.constant dense<0xFF800000> : vector<8xf32>
    %17 = vector.multi_reduction <maximumf>, %6, %cst_7 [1] : vector<8x8xf32> to vector<8xf32>
    %18 = vector.shape_cast %17 : vector<8xf32> to vector<8x1xf32>
    %19 = vector.broadcast %18 : vector<8x1xf32> to vector<8x8xf32>
    %20 = arith.subf %6, %19 : vector<8x8xf32>
    %21 = math.exp %20 : vector<8x8xf32>
    %cst_8 = arith.constant dense<0.000000e+00> : vector<8xf32>
    %22 = vector.multi_reduction <add>, %21, %cst_8 [1] : vector<8x8xf32> to vector<8xf32>
    %23 = vector.shape_cast %22 : vector<8xf32> to vector<8x1xf32>
    %24 = vector.broadcast %23 : vector<8x1xf32> to vector<8x8xf32>
    %25 = arith.divf %21, %24 : vector<8x8xf32>
    %26 = arith.mulf %6, %25 : vector<8x8xf32>
    %cst_9 = arith.constant dense<0xFF800000> : vector<8xf32>
    %27 = vector.multi_reduction <maximumf>, %16, %cst_9 [1] : vector<8x8xf32> to vector<8xf32>
    %28 = vector.shape_cast %27 : vector<8xf32> to vector<8x1xf32>
    %29 = vector.broadcast %28 : vector<8x1xf32> to vector<8x8xf32>
    %30 = arith.subf %16, %29 : vector<8x8xf32>
    %31 = math.exp %30 : vector<8x8xf32>
    %cst_10 = arith.constant dense<0.000000e+00> : vector<8xf32>
    %32 = vector.multi_reduction <add>, %31, %cst_10 [1] : vector<8x8xf32> to vector<8xf32>
    %33 = vector.shape_cast %32 : vector<8xf32> to vector<8x1xf32>
    %34 = math.log %33 : vector<8x1xf32>
    %35 = arith.addf %34, %28 : vector<8x1xf32>
    %cst_11 = arith.constant dense<0xFF800000> : vector<8xf32>
    %36 = vector.multi_reduction <maximumf>, %26, %cst_11 [0] : vector<8x8xf32> to vector<8xf32>
    %37 = vector.shape_cast %36 : vector<8xf32> to vector<1x8xf32>
    %38 = vector.broadcast %37 : vector<1x8xf32> to vector<8x8xf32>
    %39 = arith.subf %26, %38 : vector<8x8xf32>
    %40 = math.exp %39 : vector<8x8xf32>
    %cst_12 = arith.constant dense<0.000000e+00> : vector<8xf32>
    %41 = vector.multi_reduction <add>, %40, %cst_12 [0] : vector<8x8xf32> to vector<8xf32>
    %42 = vector.shape_cast %41 : vector<8xf32> to vector<1x8xf32>
    %43 = math.log %42 : vector<1x8xf32>
    %44 = arith.addf %43, %37 : vector<1x8xf32>
    %45 = tpu.iota {dimensions = array<i32: 0>} : vector<8x8xi32>
    %46 = tpu.iota {dimensions = array<i32: 1>} : vector<8x8xi32>
    %47 = arith.cmpi eq, %45, %46 : vector<8x8xi32>
    %48 = arith.addf %16, %26 : vector<8x8xf32>
    %cst_13 = arith.constant 0.000000e+00 : f32
    %49 = vector.broadcast %cst_13 : f32 to vector<8x8xf32>
    %50 = arith.select %47, %48, %49 : vector<8x8xi1>, vector<8x8xf32>
    %51 = vector.shape_cast %50 : vector<8x8xf32> to vector<1x8x8xf32>
    %cst_14 = arith.constant dense<0.000000e+00> : vector<1xf32>
    %52 = vector.multi_reduction <add>, %51, %cst_14 [1, 2] : vector<1x8x8xf32> to vector<1xf32>
    %53 = vector.shape_cast %52 : vector<1xf32> to vector<1x1x1xf32>
    %54 = vector.extract %53[0, 0, 0] : f32 from vector<1x1x1xf32>
    %55 = vector.shape_cast %35 : vector<8x1xf32> to vector<1x8x1xf32>
    %cst_15 = arith.constant dense<0.000000e+00> : vector<1xf32>
    %56 = vector.multi_reduction <add>, %55, %cst_15 [1, 2] : vector<1x8x1xf32> to vector<1xf32>
    %57 = vector.shape_cast %56 : vector<1xf32> to vector<1x1x1xf32>
    %58 = vector.extract %57[0, 0, 0] : f32 from vector<1x1x1xf32>
    %59 = vector.shape_cast %44 : vector<1x8xf32> to vector<1x1x8xf32>
    %cst_16 = arith.constant dense<0.000000e+00> : vector<1xf32>
    %60 = vector.multi_reduction <add>, %59, %cst_16 [1, 2] : vector<1x1x8xf32> to vector<1xf32>
    %61 = vector.shape_cast %60 : vector<1xf32> to vector<1x1x1xf32>
    %62 = vector.extract %61[0, 0, 0] : f32 from vector<1x1x1xf32>
    %63 = arith.addf %58, %62 : f32
    %64 = arith.subf %63, %54 : f32
    %cst_17 = arith.constant 8.000000e+00 : f32
    %65 = arith.divf %64, %cst_17 : f32
    %c0_18 = arith.constant 0 : index
    %c0_19 = arith.constant 0 : index
    %66 = memref.load %arg3[%c0_18, %c0_19] : memref<1x1xf32, #tpu.memory_space<smem>>
    memref.store %65, %arg3[%c0_18, %c0_19] : memref<1x1xf32, #tpu.memory_space<smem>>
    return
  }
}

</mosaic_0001>

<bundles_post_ra>
// kernel: tpu_custom_call.1
= control target key start
LH: loop header
LB: loop body
LE: loop exit
PB: predicated region body
PF: predicated region fallthrough
CT: control target
= control target key end

     0   :  { %s398_s0 = inlined_call_operand.<no memory space> [shape: f32[1,1], index: 0, kind: input, shape index: {}]   ;;  %s399_s1 = inlined_call_operand.hbm [shape: f32[8,32], index: 1, kind: input, shape index: {}]   ;;  %s400_s2 = inlined_call_operand.hbm [shape: f32[8,32], index: 2, kind: input, shape index: {}]   ;;  %s401_s3 = inlined_call_operand.hbm [shape: f32[1,1], index: 3, kind: output, shape index: {}]  }
   0x1   :  { %v8_v0 = vstv %s398_s0 }
   0x2   :  { %9 = vst [vmem:[#allocation2] sm:$0x1] %v8_v0 }
   0x3   :  { %10 = vsyncpa [#allocation4], 0 }
   0x4   :  { %11 = vsyncpa [#allocation7], 0 }
   0x5   :  { %12 = vsyncpa [#allocation5], 0  ;;  %s352_s14 = smov [#allocation3]   ;;  %s353_s16 = smov [#allocation6]  }
   0x6   :  { %s21_s15 = sshll.u32 %s352_s14, 4  ;;  %s31_s17 = sshll.u32 %s353_s16, 4  ;;  %s22_s15 = int_to_ptr.vmem [resolvable:$true] %s21_s15  ;;  %s32_s17 = int_to_ptr.vmem [resolvable:$true] %s31_s17 }
   0x7   :  { %s306_s18 = scalar_lea.vmem %s22_s15, 128  ;;  %p311_p1 = scmp.lt.s32.totalorder %s22_s15, %s22_s15 }
   0x8   :  { %p307_p0 = scmp.ne.s32.totalorder %s22_s15, %s306_s18  ;;  %p312_p2 = scmp.lt.s32.totalorder %s306_s18, %s306_s18 }
   0xa   :  { %p313_p3 = por %p312_p2, %p311_p1 }
   0xc   :  { %p314_p4 = pnand %p313_p3, %p307_p0 }
   0xe   :  { %317 = shalt.err (!%p314_p4)
}
   0xf   :  { %24 = dma.hbm_to_vmem [thread:$0]  %s399_s1, 128, %s22_s15, [#allocation4]  }
  0x10   :  { %s326_s0 = scalar_lea.vmem %s32_s17, 128  ;;  %p331_p6 = scmp.lt.s32.totalorder %s32_s17, %s32_s17 }
  0x11   :  { %p327_p5 = scmp.ne.s32.totalorder %s32_s17, %s326_s0  ;;  %p332_p7 = scmp.lt.s32.totalorder %s326_s0, %s326_s0 }
  0x13   :  { %p333_p8 = por %p332_p7, %p331_p6 }
  0x15   :  { %p334_p9 = pnand %p333_p8, %p327_p5 }
  0x17   :  { %337 = shalt.err (!%p334_p9)
}
  0x18   :  { %34 = dma.hbm_to_vmem [thread:$0]  %s400_s2, 128, %s32_s17, [#allocation7]  }
  0x19   :  { %346 = dma.done.wait [#allocation4], 128  }
  0x1a   :  { %347 = vsyncadd [#allocation4], 4294967168 }
  0x1b   :  { %348 = dma.done.wait [#allocation7], 128  }
  0x1c   :  { %349 = vsyncadd [#allocation7], 4294967168  ;;  %v354_v1 = vmov 0.0   ;;  %vm355_vm0 = vmmov 0   ;;  %v356_v2 = vmov 0   ;;  %vm46_vm1 = vcmask 261120  }
  0x1d   :  { %262 = vmatprep.subr.mxu0 %v354_v1  ;;  %264 = vmatprep.mubr.msk.f32.mxu0 %vm355_vm0, %v354_v1  ;;  %v42_v3 = vld [vmem:[#allocation6] sm:$0xff]  ;;  %v43_v4 = vld [vmem:[#allocation2] sm:$0x1]  ;;  %v41_v5 = vld [vmem:[#allocation3] sm:$0xff]  ;;  %v124_v7 = vlaneseq  ;;  %vm133_vm2 = vcmask 64512   ;;  %vm214_vm4 = vcmask 7168  }
  0x1e   :  { %279 = vset.pattern.permute.xlu0 %v356_v2  ;;  %263 = vmatpush3.xpose.msk.msra.mxu0 %vm46_vm1, %v42_v3  ;;  %v44_v6 = vmul.f32 1.442695, %v43_v4  ;;  %vm225_vm5 = vcmask 57344   ;;  %s357_s27 = smov [#allocation8]  }
  0x1f   :  { %v125_v8 = vshrl.u32 %v124_v7, 7  ;;  %v200_v49 = vand.u32 127, %v124_v7 }
  0x20   :  { %280 = vpow2.f32 %v44_v6 }
  0x21   :  { %265 = vmatmul.mubr.msk.f32.vlgmr.msra.gmra.mxu0 %vm46_vm1, %v41_v5  ;;  %v126_v9 = vsub.s32 0, %v125_v8  ;;  %vm201_vm3 = vcmp.eq.s32.totalorder %v125_v8, %v200_v49 }
  0x2d   :  { %v281_v10 = vpop.eup %280 }
  0x2e   :  { %v127_v11 = vrot.slane %v281_v10, %v126_v9 }
  0x30   :  { %129 = vperm.xlu0 %279, %v127_v11  }
  0xab   :  { %v130_v12 = vpop.permute.xlu0 %129 }
  0xe1   :  { %v119_v13 = vpop.f32.mrf.mxu0 }
  0xe2   :  { %v132_v14 = vmul.f32 %v130_v12, %v119_v13 }
  0xe3   :  { %v266_v15 = vpop.f32.mrf.mxu0 }
  0xe4   :  { %v134_v16 = vsel %vm133_vm2, %v132_v14, -inf }
  0xe5   :  { %154 = vmax.xlane.f32.xlu0 %v134_v16  ;;  %v135_v17 = vrot.slane %v134_v16, 4 }
  0xe7   :  { %v136_v18 = vmax.f32 %v134_v16, %v135_v17 }
  0xe9   :  { %v137_v19 = vrot.slane %v136_v18, 2 }
  0xeb   :  { %v138_v20 = vmax.f32 %v136_v18, %v137_v19 }
  0xed   :  { %v139_v21 = vrot.slane %v138_v20, 1 }
  0xef   :  { %v140_v22 = vmax.f32 %v138_v20, %v139_v21 }
  0xf1   :  { %v141_v23 = vsub.f32 %v132_v14, %v140_v22 }
  0xf3   :  { %v142_v24 = vmul.f32 1.442695, %v141_v23 }
  0xf5   :  { %282 = vpow2.f32 %v142_v24 }
 0x102   :  { %v283_v25 = vpop.eup %282 }
 0x103   :  { %v144_v26 = vsel %vm133_vm2, %v283_v25, 0.0 }
 0x104   :  { %v145_v27 = vrot.slane %v144_v26, 4 }
 0x106   :  { %v146_v28 = vadd.f32 %v145_v27, %v144_v26 }
 0x108   :  { %v147_v29 = vrot.slane %v146_v28, 2 }
 0x10a   :  { %v148_v30 = vadd.f32 %v147_v29, %v146_v28 }
 0x10c   :  { %v149_v31 = vrot.slane %v148_v30, 1 }
 0x10e   :  { %v150_v32 = vadd.f32 %v149_v31, %v148_v30 }
 0x110   :  { %284 = vrcp.f32 %v150_v32 }
 0x11d   :  { %v285_v33 = vpop.eup %284 }
 0x11e   :  { %v152_v34 = vmul.f32 %v285_v33, %v283_v25 }
 0x120   :  { %v153_v35 = vmul.f32 %v152_v34, %v132_v14 }
 0x122   :  { %v165_v36 = vsel %vm133_vm2, %v153_v35, -inf }
 0x123   :  { %166 = vmax.xlane.f32.xlu1 %v165_v36 }
 0x16e   :  { %v155_v37 = vpop.xlane.xlu0 %154 }
 0x16f   :  { %v156_v38 = vsub.f32 %v132_v14, %v155_v37 }
 0x171   :  { %v157_v39 = vmul.f32 1.442695, %v156_v38 }
 0x173   :  { %286 = vpow2.f32 %v157_v39 }
 0x180   :  { %v287_v40 = vpop.eup %286 }
 0x181   :  { %v159_v41 = vsel %vm133_vm2, %v287_v40, 0.0 }
 0x182   :  { %160 = vadd.xlane.f32.xlu1 %v159_v41 }
 0x1ac   :  { %v167_v42 = vpop.xlane.xlu1 %166 }
 0x1ad   :  { %v168_v43 = vsub.f32 %v153_v35, %v167_v42 }
 0x1af   :  { %v169_v44 = vmul.f32 1.442695, %v168_v43 }
 0x1b1   :  { %288 = vpow2.f32 %v169_v44 }
 0x1be   :  { %v289_v45 = vpop.eup %288 }
 0x1bf   :  { %v171_v46 = vsel %vm133_vm2, %v289_v45, 0.0 }
 0x1c0   :  { %172 = vadd.xlane.f32.xlu1 %v171_v46 }
 0x20b   :  { %v161_v47 = vpop.xlane.xlu1 %160 }
 0x20c   :  { %290 = vrcp.f32 %v161_v47 }
 0x219   :  { %v291_v48 = vpop.eup %290 }
 0x21a   :  { %v163_v50 = vmul.f32 %v291_v48, %v287_v40 }
 0x21c   :  { %v164_v51 = vmul.f32 %v163_v50, %v132_v14 }
 0x21e   :  { %v202_v52 = vadd.f32 %v164_v51, %v153_v35  ;;  %v177_v53 = vsel %vm133_vm2, %v164_v51, -inf }
 0x21f   :  { %v178_v54 = vrot.slane %v177_v53, 4 }
 0x220   :  { %v203_v55 = vsel %vm201_vm3, %v202_v52, 0.0 }
 0x221   :  { %v204_v56 = vsel %vm133_vm2, %v203_v55, 0.0  ;;  %v179_v57 = vmax.f32 %v177_v53, %v178_v54 }
 0x222   :  { %205 = vadd.xlane.f32.xlu1 %v204_v56 }
 0x223   :  { %v180_v58 = vrot.slane %v179_v57, 2 }
 0x225   :  { %v181_v59 = vmax.f32 %v179_v57, %v180_v58 }
 0x227   :  { %v182_v60 = vrot.slane %v181_v59, 1 }
 0x229   :  { %v183_v61 = vmax.f32 %v181_v59, %v182_v60 }
 0x22b   :  { %v184_v62 = vsub.f32 %v164_v51, %v183_v61 }
 0x22d   :  { %v185_v63 = vmul.f32 1.442695, %v184_v62 }
 0x22f   :  { %292 = vpow2.f32 %v185_v63 }
 0x23c   :  { %v293_v0 = vpop.eup %292 }
 0x23d   :  { %v187_v1 = vsel %vm133_vm2, %v293_v0, 0.0 }
 0x23e   :  { %v188_v2 = vrot.slane %v187_v1, 4 }
 0x240   :  { %v189_v3 = vadd.f32 %v188_v2, %v187_v1 }
 0x242   :  { %v190_v4 = vrot.slane %v189_v3, 2 }
 0x244   :  { %v191_v5 = vadd.f32 %v190_v4, %v189_v3 }
 0x246   :  { %v192_v6 = vrot.slane %v191_v5, 1 }
 0x248   :  { %v193_v7 = vadd.f32 %v192_v6, %v191_v5 }
 0x249   :  { %v173_v8 = vpop.xlane.xlu1 %172 }
 0x24a   :  { %294 = vlog2.f32 %v173_v8 }
 0x24b   :  { %296 = vlog2.f32 %v193_v7 }
 0x257   :  { %v295_v9 = vpop.eup %294 }
 0x258   :  { %v297_v10 = vpop.eup %296  ;;  %v175_v11 = vmul.f32 0.6931472, %v295_v9 }
 0x259   :  { %v195_v12 = vmul.f32 0.6931472, %v297_v10 }
 0x25a   :  { %v176_v13 = vadd.f32 %v175_v11, %v167_v42 }
 0x25b   :  { %v196_v15 = vadd.f32 %v195_v12, %v183_v61 }
 0x25c   :  { %v215_v14 = vsel %vm214_vm4, %v176_v13, 0.0 }
 0x25d   :  { %216 = vadd.xlane.f32.xlu1 %v215_v14  ;;  %v226_v16 = vsel %vm225_vm5, %v196_v15, 0.0 }
 0x261   :  { %227 = vadd.xlane.f32.xlu1 %v226_v16 }
 0x2ab   :  { %v206_v17 = vpop.xlane.xlu1 %205 }
 0x2ac   :  { %v207_v18 = vrot.slane %v206_v17, 4 }
 0x2ae   :  { %v208_v19 = vadd.f32 %v207_v18, %v206_v17 }
 0x2b0   :  { %v209_v20 = vrot.slane %v208_v19, 2 }
 0x2b2   :  { %v210_v21 = vadd.f32 %v209_v20, %v208_v19 }
 0x2b4   :  { %v211_v22 = vrot.slane %v210_v21, 1 }
 0x2b6   :  { %v212_v23 = vadd.f32 %v211_v22, %v210_v21 }
 0x2b8   :  { %267 = vpush %v212_v23 }
 0x2e6   :  { %v217_v24 = vpop.xlane.xlu1 %216 }
 0x2e7   :  { %v218_v25 = vrot.slane %v217_v24, 4 }
 0x2e9   :  { %v219_v26 = vadd.f32 %v218_v25, %v217_v24  ;;  %s268_s1 = spop %267 }
 0x2ea   :  { %v228_v27 = vpop.xlane.xlu1 %227 }
 0x2eb   :  { %v220_v28 = vrot.slane %v219_v26, 2  ;;  %v229_v29 = vrot.slane %v228_v27, 4 }
 0x2ed   :  { %v230_v30 = vadd.f32 %v229_v29, %v228_v27  ;;  %v221_v31 = vadd.f32 %v220_v28, %v219_v26 }
 0x2ef   :  { %v231_v32 = vrot.slane %v230_v30, 2  ;;  %v222_v33 = vrot.slane %v221_v31, 1 }
 0x2f1   :  { %v232_v34 = vadd.f32 %v231_v32, %v230_v30  ;;  %v223_v35 = vadd.f32 %v222_v33, %v221_v31 }
 0x2f3   :  { %269 = vpush %v223_v35  ;;  %v233_v36 = vrot.slane %v232_v34, 1 }
 0x2f5   :  { %v234_v37 = vadd.f32 %v233_v36, %v232_v34 }
 0x2f7   :  { %271 = vpush %v234_v37 }
 0x324   :  { %s270_s2 = spop %269 }
 0x328   :  { %s272_s23 = spop %271 }
 0x329   :  { %s236_s24 = sadd.f32 %s272_s23, %s270_s2 }
 0x32b   :  { %s237_s25 = ssub.f32 %s236_s24, %s268_s1 }
 0x32d   :  { %s240_s26 = smul.f32 0.125, %s237_s25 }
 0x32f   :  { %242 = sst [smem:[#allocation8]] %s240_s26 }
 0x330   :  { %250 = dma.smem_to_hbm %s357_s27, 16, %s401_s3, [#allocation5]  }
 0x331   :  { %350 = dma.done.wait [#allocation5], 16  }
 0x332   :  { %351 = vsyncadd [#allocation5], 4294967280 }
 0x333   :  { %254 = sfence }
 0x334   :  { %255 = vsyncpa [#allocation4], 1 }
 0x335   :  { %256 = vsyncpa [#allocation7], 1 }
 0x336   :  { %257 = vsyncpa [#allocation5], 1 }

</bundles_post_ra>
